<compile_context>
chip_gen: v7x
topology: tpu7x:2x2x1
jax: 0.10.0
libtpu: 0.0.40
codegen_flags: <defaults>
</compile_context>

<pallas_src>
import jax
import jax.numpy as jnp
from jax.experimental import pallas as pl
from jax.experimental.pallas import tpu as pltpu

EPS = 1e-5

# Tile caps (f32): 512 x 2048 * 4 B = 4 MiB per x block; double-buffered x + out
# + params stays well inside the scoped-VMEM budget on v5e / v6e / v7x.
_TILE_B_CAP = 512
_TILE_F_CAP = 2048


def _norm1d_kernel(x_ref, scale_ref, shift_ref, o_ref):
    # x_ref: (tile_b, tile_f); scale/shift: (1, tile_f) -> broadcast over batch rows.
    o_ref[...] = x_ref[...] * scale_ref[...] + shift_ref[...]


def _pick_tile(dim, unit, cap):
    """Largest multiple of `unit` that is <= cap and divides `dim`; else the full dim."""
    if dim <= cap:
        return dim
    t = (cap // unit) * unit
    while t >= unit:
        if dim % t == 0:
            return t
        t -= unit
    # No aligned divisor found: fall back to the full dim (block == array dim is legal).
    return dim


def norm_function_1d(x, m, v, gamma, beta, *, tile_b=None, tile_f=None):
    """Pallas implementation of NormFunction1D.forward.

    x: (B, F) float32; m, v, gamma, beta: (1, F) float32.
    """
    B, F = x.shape

    # Fold the four (1, F) parameters into a single scale/shift pair (O(F) work,
    # mathematically identical to (x - m) / sqrt(v + eps) * gamma + beta).
    scale = gamma * jax.lax.rsqrt(v + EPS)
    shift = beta - m * scale

    if tile_b is None:
        tile_b = _pick_tile(B, 8, _TILE_B_CAP)
    if tile_f is None:
        tile_f = _pick_tile(F, 128, _TILE_F_CAP)
    assert B % tile_b == 0 and F % tile_f == 0

    grid = (B // tile_b, F // tile_f)

    x_spec = pl.BlockSpec((tile_b, tile_f), lambda i, j: (i, j))
    param_spec = pl.BlockSpec((1, tile_f), lambda i, j: (0, j))
    out_spec = pl.BlockSpec((tile_b, tile_f), lambda i, j: (i, j))

    # Scoped-VMEM budget: double-buffered x + out blocks, double-buffered params,
    # plus a little headroom. Keeps larger-than-default tiles compiling on v5e's
    # 16 MiB / v6e+v7x's 32 MiB scoped defaults without approaching physical VMEM.
    bpe = jnp.dtype(x.dtype).itemsize
    blk_bytes = tile_b * tile_f * bpe
    param_bytes = tile_f * bpe
    vmem_limit = 2 * (2 * blk_bytes) + 2 * (2 * param_bytes) + (2 << 20)

    return pl.pallas_call(
        _norm1d_kernel,
        out_shape=jax.ShapeDtypeStruct((B, F), x.dtype),
        grid_spec=pl.GridSpec(
            grid=grid,
            in_specs=[x_spec, param_spec, param_spec],
            out_specs=out_spec,
        ),
        compiler_params=pltpu.CompilerParams(
            dimension_semantics=("parallel", "parallel"),
            vmem_limit_bytes=int(vmem_limit),
        ),
    )(x, scale, shift)


def _reference(x, m, v, gamma, beta):
    return (x - m) / jnp.sqrt(v + EPS) * gamma + beta


if __name__ == "__main__":
    key = jax.random.PRNGKey(0)

    def make_inputs(batch, features):
        kx, km, kv = jax.random.split(jax.random.fold_in(key, batch), 3)
        x = jax.random.normal(kx, (batch, features), dtype=jnp.float32)
        gamma = jnp.ones((1, features), dtype=jnp.float32)
        beta = jnp.zeros((1, features), dtype=jnp.float32)
        m = jnp.ones((1, features), dtype=jnp.float32) + 0.1 * jax.random.normal(
            km, (1, features), dtype=jnp.float32)
        v = jnp.ones((1, features), dtype=jnp.float32) + 0.1 * jnp.abs(
            jax.random.normal(kv, (1, features), dtype=jnp.float32))
        return x, m, v, gamma, beta

    # 1) Module-sized demo (8, 32): single full-array block. NOTE: at this size a plain
    #    jnp expression would beat the kernel (per-call overhead, 32-wide masked stores);
    #    kept on the Pallas path here to exercise the kernel itself.
    x, m, v, gamma, beta = make_inputs(8, 32)
    out = jax.block_until_ready(norm_function_1d(x, m, v, gamma, beta))
    ref = _reference(x, m, v, gamma, beta)
    assert out.shape == (8, 32)
    assert jnp.allclose(out, ref, atol=1e-5, rtol=1e-5), "mismatch vs reference (8,32)"

    # 2) Larger shape exercising the tiled, multi-step, lane-dense path
    #    (grid = (2, 1), tile_b = 512, tile_f = 256).
    x, m, v, gamma, beta = make_inputs(1024, 256)
    out = jax.block_until_ready(norm_function_1d(x, m, v, gamma, beta))
    ref = _reference(x, m, v, gamma, beta)
    assert out.shape == (1024, 256)
    assert jnp.allclose(out, ref, atol=1e-5, rtol=1e-5), "mismatch vs reference (1024,256)"

    print("KERNEL_OK")
</pallas_src>

<mosaic_0001>
module attributes {stable_mosaic.version = 11 : i64} {
  func.func @_norm1d_kernel(%arg0: i32, %arg1: i32, %arg2: memref<8x32xf32, #tpu.memory_space<vmem>>, %arg3: memref<1x32xf32, #tpu.memory_space<vmem>>, %arg4: memref<1x32xf32, #tpu.memory_space<vmem>>, %arg5: memref<8x32xf32, #tpu.memory_space<vmem>>) attributes {dimension_semantics = [#tpu.dimension_semantics<parallel>, #tpu.dimension_semantics<parallel>], iteration_bounds = array<i64: 1, 1>, scalar_prefetch = 0 : i64, scratch_operands = 0 : i64, tpu.core_type = #tpu.core_type<tc>, window_params = [{transform_indices = @transform_0, window_bounds = array<i64: 8, 32>}, {transform_indices = @transform_1, window_bounds = array<i64: 1, 32>}, {transform_indices = @transform_2, window_bounds = array<i64: 1, 32>}, {transform_indices = @transform_3, window_bounds = array<i64: 8, 32>}]} {
    %c0 = arith.constant 0 : index
    %c0_0 = arith.constant 0 : index
    %0 = vector.load %arg2[%c0, %c0_0] : memref<8x32xf32, #tpu.memory_space<vmem>>, vector<8x32xf32>
    %c0_1 = arith.constant 0 : index
    %c0_2 = arith.constant 0 : index
    %1 = vector.load %arg3[%c0_1, %c0_2] : memref<1x32xf32, #tpu.memory_space<vmem>>, vector<1x32xf32>
    %2 = vector.broadcast %1 : vector<1x32xf32> to vector<8x32xf32>
    %3 = arith.mulf %0, %2 : vector<8x32xf32>
    %c0_3 = arith.constant 0 : index
    %c0_4 = arith.constant 0 : index
    %4 = vector.load %arg4[%c0_3, %c0_4] : memref<1x32xf32, #tpu.memory_space<vmem>>, vector<1x32xf32>
    %5 = vector.broadcast %4 : vector<1x32xf32> to vector<8x32xf32>
    %6 = arith.addf %3, %5 : vector<8x32xf32>
    %c0_5 = arith.constant 0 : index
    %c0_6 = arith.constant 0 : index
    %7 = vector.load %arg5[%c0_5, %c0_6] : memref<8x32xf32, #tpu.memory_space<vmem>>, vector<8x32xf32>
    tpu.vector_store %arg5[%c0_5, %c0_6], %6 {strides = array<i32>} : memref<8x32xf32, #tpu.memory_space<vmem>>, vector<8x32xf32>,
    return
  }
  func.func @transform_0(%arg0: i32, %arg1: i32) -> (i32, i32) {
    %c0_i32 = arith.constant 0 : i32
    return %arg0, %arg1 : i32, i32
  }
  func.func @transform_1(%arg0: i32, %arg1: i32) -> (i32, i32) {
    %c0_i32 = arith.constant 0 : i32
    %c0_i32_0 = arith.constant 0 : i32
    return %c0_i32, %arg1 : i32, i32
  }
  func.func @transform_2(%arg0: i32, %arg1: i32) -> (i32, i32) {
    %c0_i32 = arith.constant 0 : i32
    %c0_i32_0 = arith.constant 0 : i32
    return %c0_i32, %arg1 : i32, i32
  }
  func.func @transform_3(%arg0: i32, %arg1: i32) -> (i32, i32) {
    %c0_i32 = arith.constant 0 : i32
    return %arg0, %arg1 : i32, i32
  }
}

</mosaic_0001>

<bundles_post_ra>
// kernel: tpu_custom_call.1
= control target key start
LH: loop header
LB: loop body
LE: loop exit
PB: predicated region body
PF: predicated region fallthrough
CT: control target
= control target key end

     0   :  { %8 = vsyncpa [#allocation3], 0  ;;  %s165_s0 = inlined_call_operand.hbm [shape: f32[8,32], index: 0, kind: input, shape index: {}]   ;;  %s166_s1 = inlined_call_operand.vmem [shape: f32[1,32], index: 1, kind: input, shape index: {}]   ;;  %s167_s2 = inlined_call_operand.vmem [shape: f32[1,32], index: 2, kind: input, shape index: {}]   ;;  %s168_s3 = inlined_call_operand.hbm [shape: f32[8,32], index: 3, kind: output, shape index: {}]  }
   0x1   :  { %9 = vsyncpa [#allocation4], 0  ;;  %s113_s12 = smov [#allocation2]   ;;  %s65_s16 = scalar_lea.hbm %s165_s0, 128 }
   0x2   :  { %s16_s13 = sshll.u32 %s113_s12, 4  ;;  %p66_p0 = scmp.ne.s32.totalorder %s165_s0, %s65_s16  ;;  %s17_s13 = int_to_ptr.vmem [resolvable:$true] %s16_s13 }
   0x3   :  { %p69_p1 = scmp.lt.u32.totalorder %s65_s16, %s165_s0 }
   0x5   :  { %p71_p2 = pnand %p69_p1, %p66_p0 }
   0x7   :  { %74 = shalt.err (!%p71_p2)
}
   0x8   :  { %s75_s21 = scalar_lea.vmem %s17_s13, 128  ;;  %p80_p4 = scmp.lt.s32.totalorder %s17_s13, %s17_s13 }
   0x9   :  { %p76_p3 = scmp.ne.s32.totalorder %s17_s13, %s75_s21  ;;  %p81_p5 = scmp.lt.s32.totalorder %s75_s21, %s75_s21 }
   0xb   :  { %p82_p6 = por %p81_p5, %p80_p4 }
   0xd   :  { %p83_p7 = pnand %p82_p6, %p76_p3 }
   0xf   :  { %86 = shalt.err (!%p83_p7)
}
  0x10   :  { %19 = dma.hbm_to_vmem [thread:$0]  %s165_s0, 128, %s17_s13, [#allocation3]  }
  0x11   :  { %109 = dma.done.wait [#allocation3], 128  }
  0x12   :  { %110 = vsyncadd [#allocation3], 4294967168  ;;  %v27_v0 = vld [vmem:[#allocation2] sm:$0xff]  ;;  %s114_s28 = smov [#allocation5]   ;;  %vm44_vm0 = vcmask 261120  }
  0x13   :  { %v61_v1 = vld [vmem:[%s166_s1] ss:$0 sm:$0xff]  ;;  %s52_s29 = sshll.u32 %s114_s28, 4  ;;  %s53_s29 = int_to_ptr.vmem [resolvable:$true] %s52_s29 }
  0x14   :  { %v62_v2 = vld [vmem:[%s167_s2] ss:$0 sm:$0xff]  ;;  %v35_v3 = vmul.f32 %v61_v1, %v27_v0  ;;  %s87_s30 = scalar_lea.vmem %s53_s29, 128  ;;  %p92_p9 = scmp.lt.s32.totalorder %s53_s29, %s53_s29 }
  0x15   :  { %p88_p8 = scmp.ne.s32.totalorder %s53_s29, %s87_s30  ;;  %p93_p10 = scmp.lt.s32.totalorder %s87_s30, %s87_s30 }
  0x16   :  { %v43_v4 = vadd.f32 %v62_v2, %v35_v3 }
  0x17   :  { %p94_p11 = por %p93_p10, %p92_p9 }
  0x18   :  { %45 = vst.msk [vmem:[#allocation5] sm:$0xff] %vm44_vm0, %v43_v4 }
  0x19   :  { %p95_p12 = pnand %p94_p11, %p88_p8 }
  0x1b   :  { %98 = shalt.err (!%p95_p12)
}
  0x1c   :  { %s99_s4 = scalar_lea.hbm %s168_s3, 128 }
  0x1d   :  { %p100_p13 = scmp.ne.s32.totalorder %s168_s3, %s99_s4  ;;  %p103_p0 = scmp.lt.u32.totalorder %s99_s4, %s168_s3 }
  0x1f   :  { %p105_p1 = pnand %p103_p0, %p100_p13 }
  0x21   :  { %108 = shalt.err (!%p105_p1)
}
  0x22   :  { %55 = dma.vmem_to_hbm [thread:$0]  %s53_s29, 128, %s168_s3, [#allocation4]  }
  0x23   :  { %111 = dma.done.wait [#allocation4], 128  }
  0x24   :  { %112 = vsyncadd [#allocation4], 4294967168 }
  0x25   :  { %59 = vsyncpa [#allocation3], 1 }
  0x26   :  { %60 = vsyncpa [#allocation4], 1 }

</bundles_post_ra>
